<compile_context>
chip_gen: v5e
topology: v5e:2x2
jax: 0.10.0
libtpu: 0.0.40
codegen_flags: <defaults>
</compile_context>

<pallas_src>
import jax
import jax.numpy as jnp
from jax.experimental import pallas as pl
from jax.experimental.pallas import tpu as pltpu


def _round_up(x, m):
    return ((x + m - 1) // m) * m


def _pad_last(x, to):
    pad = to - x.shape[-1]
    if pad == 0:
        return x
    return jnp.pad(x, [(0, 0)] * (x.ndim - 1) + [(0, pad)])


# ---------------------------------------------------------------------------
# Pallas kernel (one batch tile per grid step)
#   pooled_ref : (tb, C)   bf16  GAP'd image features
#   skelp_ref  : (tb, E)   bf16  graph-aggregated skeleton features (pre-projection)
#   w_img_ref  : (C,  E)   bf16  image-branch projection
#   w_skel_ref : (E,  E)   bf16  skeleton-branch projection
#   wf_img_ref : (E,  Ep)  bf16  fusion weight, image half    (rows [0:E]  of W^T)
#   wf_skel_ref: (E,  Ep)  bf16  fusion weight, skeleton half (rows [E:2E] of W^T)
#   b_ref      : (1,  Ep)  f32   fusion bias (lane-padded)
#   out_ref    : (tb, Ep)
# concat-free fusion linear: cat([img, skel]) @ W^T == img @ W^T[:E] + skel @ W^T[E:]
# ---------------------------------------------------------------------------
def _fusion_kernel(pooled_ref, skelp_ref, w_img_ref, w_skel_ref,
                   wf_img_ref, wf_skel_ref, b_ref, out_ref):
    wt = wf_img_ref.dtype
    # image branch -> accumulate (keeps at most two (tb, Ep) f32 tiles live)
    img_feat = jnp.tanh(jnp.dot(pooled_ref[...], w_img_ref[...],
                                preferred_element_type=jnp.float32))
    fused = jnp.dot(img_feat.astype(wt), wf_img_ref[...],
                    preferred_element_type=jnp.float32)
    del img_feat
    # skeleton branch -> accumulate
    skel_emb = jnp.tanh(jnp.dot(skelp_ref[...], w_skel_ref[...],
                                preferred_element_type=jnp.float32))
    fused = fused + jnp.dot(skel_emb.astype(wt), wf_skel_ref[...],
                            preferred_element_type=jnp.float32)
    out_ref[...] = (fused + b_ref[...]).astype(out_ref.dtype)


# ---------------------------------------------------------------------------
# One-time parameter preparation (hoisted out of the forward pass):
# split the fusion weight into its two halves, lane-pad to a 128 multiple,
# cast MXU operands to bf16, keep the bias in f32.
# ---------------------------------------------------------------------------
def prepare_fusion_params(w_img, w_skel_out, fusion_w_t, fusion_b,
                          *, compute_dtype=jnp.bfloat16):
    C, E = w_img.shape
    assert w_skel_out.shape == (E, E)
    assert fusion_w_t.shape == (2 * E, E)
    assert fusion_b.shape == (E,)
    Ep = _round_up(E, 128)
    return dict(
        C=C, E=E, Ep=Ep,
        w_img=w_img.astype(compute_dtype),                              # (C, E)
        w_skel=w_skel_out.astype(compute_dtype),                        # (E, E)
        wf_img=_pad_last(fusion_w_t[:E], Ep).astype(compute_dtype),     # (E, Ep)
        wf_skel=_pad_last(fusion_w_t[E:], Ep).astype(compute_dtype),    # (E, Ep)
        bias=_pad_last(fusion_b.reshape(1, E), Ep).astype(jnp.float32), # (1, Ep)
    )


def fused_forward_pallas(pooled, skel_pooled, fp, *, block_b=512,
                         out_dtype=jnp.float32):
    """tanh(pooled@W_img) / tanh(skel_pooled@W_skel) -> fusion Linear, one kernel."""
    B, C = pooled.shape
    E, Ep = fp["E"], fp["Ep"]
    assert C == fp["C"] and skel_pooled.shape == (B, E)

    cdt = fp["w_img"].dtype
    pooled_c = pooled.astype(cdt)         # fuses into upstream producer under jit
    skelp_c = skel_pooled.astype(cdt)

    # Batch tiling: single block for tiny B (launch dominated); otherwise at
    # least two tiles so both v7x TensorCores get work, capped at block_b rows.
    if B <= 64:
        tb = B
    else:
        tb = min(block_b, _round_up(pl.cdiv(B, 2), 8))
    nb = pl.cdiv(B, tb)   # ragged last block: OOB reads are dead rows, writes masked

    out_itemsize = jnp.dtype(out_dtype).itemsize
    in_itemsize = jnp.dtype(cdt).itemsize
    w_bytes = (fp["w_img"].nbytes + fp["w_skel"].nbytes +
               fp["wf_img"].nbytes + fp["wf_skel"].nbytes + fp["bias"].nbytes)
    cost = pl.CostEstimate(
        flops=2 * B * (C * E + E * E + 2 * E * Ep),
        transcendentals=2 * B * E,
        bytes_accessed=B * (C + E) * in_itemsize + B * Ep * out_itemsize + w_bytes)

    # Explicit VMEM budget only when the resident footprint nears the scoped
    # default.  TODO(synk): for very large E on v7x (64 MiB VMEM), add a second
    # grid axis tiling Ep for wf_*/bias/out instead of raising the limit.
    act_bytes = 2 * tb * ((C + E) * in_itemsize + Ep * out_itemsize)
    vmem_est = 2 * w_bytes + act_bytes
    vmem_limit = None
    if vmem_est > 30 * 2**20:
        vmem_limit = min(int(vmem_est * 1.25) + 2**20, 96 * 2**20)

    def run(single_buffer_weights):
        def const_spec(shape):
            idx = lambda i: (0,) * len(shape)
            if single_buffer_weights:
                # grid-invariant block: one DMA at step 0, no need to double-buffer
                return pl.BlockSpec(shape, idx, pipeline_mode=pl.Buffered(1))
            return pl.BlockSpec(shape, idx)

        return pl.pallas_call(
            _fusion_kernel,
            out_shape=jax.ShapeDtypeStruct((B, Ep), out_dtype),
            grid=(nb,),
            in_specs=[
                pl.BlockSpec((tb, C), lambda i: (i, 0)),   # pooled (batch-tiled)
                pl.BlockSpec((tb, E), lambda i: (i, 0)),   # skel   (batch-tiled)
                const_spec((C, E)),                        # w_img  (VMEM-resident)
                const_spec((E, E)),                        # w_skel
                const_spec((E, Ep)),                       # wf_img
                const_spec((E, Ep)),                       # wf_skel
                const_spec((1, Ep)),                       # bias
            ],
            out_specs=pl.BlockSpec((tb, Ep), lambda i: (i, 0)),
            compiler_params=pltpu.CompilerParams(
                dimension_semantics=("parallel",),
                vmem_limit_bytes=vmem_limit),
            cost_estimate=cost,
        )(pooled_c, skelp_c, fp["w_img"], fp["w_skel"],
          fp["wf_img"], fp["wf_skel"], fp["bias"])

    try:
        out = run(True)
    except Exception:   # jax build rejecting single-buffered specs -> default path
        out = run(False)

    # Padded output columns are exactly zero; drop them only if E was not already
    # 128-aligned (at the real embed_dim=256 this slice disappears entirely).
    return out if Ep == E else out[:, :E]


# ---------------------------------------------------------------------------
# Deterministic stand-ins for the injected sub-modules (plain JAX glue).
# TODO(synk): image_feature_extractor / skeleton_graph_attention are injected
#             dependencies with no defined architecture in the reference code;
#             their pooling / adjacency-aggregation stages stay in JAX, while
#             their final projections + tanh are fused into the Pallas kernel.
# ---------------------------------------------------------------------------
def image_feature_pool(source_image):
    # NCHW -> global average pool over H, W -> (B, C)
    return jnp.mean(source_image, axis=(2, 3))


def skeleton_graph_pool(joint_coords, bone_edges, w_proj):
    # joint_coords: (B, J, 3); bone_edges: (nE, 2) int32
    J = joint_coords.shape[1]
    adj = jnp.zeros((J, J), jnp.float32)
    adj = adj.at[bone_edges[:, 0], bone_edges[:, 1]].set(1.0)
    adj = adj.at[bone_edges[:, 1], bone_edges[:, 0]].set(1.0)
    adj = adj + jnp.eye(J, dtype=jnp.float32)
    adj = adj / jnp.sum(adj, axis=-1, keepdims=True)
    h = jnp.tanh(joint_coords @ w_proj)            # (B, J, E)
    h = jnp.einsum("ij,bjd->bid", adj, h)          # graph aggregation
    return jnp.mean(h, axis=1)                     # (B, E) — pre final projection


# ---------------------------------------------------------------------------
if __name__ == "__main__":
    B, C, H, W = 2, 4, 16, 16     # source image (NCHW)
    J = 8                         # joints
    E = 32                        # embed_dim

    key = jax.random.PRNGKey(0)
    k = jax.random.split(key, 8)

    source_image = jax.random.normal(k[0], (B, C, H, W), jnp.float32)
    joint_coords = jax.random.normal(k[1], (B, J, 3), jnp.float32)
    bone_edges = jnp.stack(
        [jnp.arange(J - 1, dtype=jnp.int32),
         jnp.arange(1, J, dtype=jnp.int32)], axis=-1)      # (J-1, 2) chain

    raw = {
        # stand-in sub-module params
        "w_img":      0.1 * jax.random.normal(k[2], (C, E), jnp.float32),
        "w_proj":     0.1 * jax.random.normal(k[3], (3, E), jnp.float32),
        "w_skel_out": 0.1 * jax.random.normal(k[4], (E, E), jnp.float32),
        # fusion nn.Linear(2E -> E): stored transposed (in, out)
        "fusion_w_t": 0.05 * jax.random.normal(k[5], (2 * E, E), jnp.float32),
        "fusion_b":   0.05 * jax.random.normal(k[6], (E,), jnp.float32),
    }
    # one-time weight preparation (padding + bf16 cast hoisted out of the forward)
    fp = prepare_fusion_params(raw["w_img"], raw["w_skel_out"],
                               raw["fusion_w_t"], raw["fusion_b"])

    def forward(src_img, joints):
        pooled = image_feature_pool(src_img)
        skel_pooled = skeleton_graph_pool(joints, bone_edges, raw["w_proj"])
        return fused_forward_pallas(pooled, skel_pooled, fp)

    def reference(src_img, joints):
        pooled = image_feature_pool(src_img)
        img_feat = jnp.tanh(pooled @ raw["w_img"])
        skel_pooled = skeleton_graph_pool(joints, bone_edges, raw["w_proj"])
        skel_emb = jnp.tanh(skel_pooled @ raw["w_skel_out"])
        return (jnp.concatenate([img_feat, skel_emb], -1) @ raw["fusion_w_t"]
                + raw["fusion_b"])

    # small-batch path (single block)
    fused = jax.block_until_ready(forward(source_image, joint_coords))
    ref = reference(source_image, joint_coords)
    assert fused.shape == (B, E)
    assert jnp.allclose(fused, ref, atol=1e-2, rtol=1e-2), (
        float(jnp.max(jnp.abs(fused - ref))))

    # multi-tile + ragged-batch path (two tiles, masked final-block writes)
    B2 = 200
    src2 = jax.random.normal(k[7], (B2, C, H, W), jnp.float32)
    joints2 = jax.random.normal(k[6], (B2, J, 3), jnp.float32)
    fused2 = jax.block_until_ready(forward(src2, joints2))
    ref2 = reference(src2, joints2)
    assert fused2.shape == (B2, E)
    assert jnp.allclose(fused2, ref2, atol=1e-2, rtol=1e-2), (
        float(jnp.max(jnp.abs(fused2 - ref2))))

    print("KERNEL_OK")
</pallas_src>

<mosaic_0001>
module attributes {stable_mosaic.version = 11 : i64} {
  func.func @_fusion_kernel(%arg0: i32, %arg1: memref<2x4xbf16, #tpu.memory_space<vmem>>, %arg2: memref<2x32xbf16, #tpu.memory_space<vmem>>, %arg3: memref<4x32xbf16, #tpu.memory_space<vmem>>, %arg4: memref<32x32xbf16, #tpu.memory_space<vmem>>, %arg5: memref<32x128xbf16, #tpu.memory_space<vmem>>, %arg6: memref<32x128xbf16, #tpu.memory_space<vmem>>, %arg7: memref<1x128xf32, #tpu.memory_space<vmem>>, %arg8: memref<2x128xf32, #tpu.memory_space<vmem>>) attributes {dimension_semantics = [#tpu.dimension_semantics<parallel>], iteration_bounds = array<i64: 1>, scalar_prefetch = 0 : i64, scratch_operands = 0 : i64, tpu.core_type = #tpu.core_type<tc>, window_params = [{transform_indices = @transform_0, window_bounds = array<i64: 2, 4>}, {transform_indices = @transform_1, window_bounds = array<i64: 2, 32>}, {pipeline_mode = #tpu.pipeline_mode<synchronous>, transform_indices = @transform_2, window_bounds = array<i64: 4, 32>}, {pipeline_mode = #tpu.pipeline_mode<synchronous>, transform_indices = @transform_3, window_bounds = array<i64: 32, 32>}, {pipeline_mode = #tpu.pipeline_mode<synchronous>, transform_indices = @transform_4, window_bounds = array<i64: 32, 128>}, {pipeline_mode = #tpu.pipeline_mode<synchronous>, transform_indices = @transform_5, window_bounds = array<i64: 32, 128>}, {pipeline_mode = #tpu.pipeline_mode<synchronous>, transform_indices = @transform_6, window_bounds = array<i64: 1, 128>}, {transform_indices = @transform_7, window_bounds = array<i64: 2, 128>}]} {
    %c0 = arith.constant 0 : index
    %c0_0 = arith.constant 0 : index
    %0 = vector.load %arg1[%c0, %c0_0] : memref<2x4xbf16, #tpu.memory_space<vmem>>, vector<2x4xbf16>
    %c0_1 = arith.constant 0 : index
    %c0_2 = arith.constant 0 : index
    %1 = vector.load %arg3[%c0_1, %c0_2] : memref<4x32xbf16, #tpu.memory_space<vmem>>, vector<4x32xbf16>
    %cst = arith.constant dense<0.000000e+00> : vector<2x32xf32>
    %2 = tpu.matmul %0, %1, %cst {dimension_numbers = #tpu.dot_dimension_numbers<[1], [0], [0], [1], [0, 0, 1, 1], [], []>} : vector<2x4xbf16>, vector<4x32xbf16>, vector<2x32xf32> -> vector<2x32xf32>
    %3 = math.tanh %2 : vector<2x32xf32>
    %4 = arith.truncf %3 : vector<2x32xf32> to vector<2x32xbf16>
    %c0_3 = arith.constant 0 : index
    %c0_4 = arith.constant 0 : index
    %5 = vector.load %arg5[%c0_3, %c0_4] : memref<32x128xbf16, #tpu.memory_space<vmem>>, vector<32x128xbf16>
    %cst_5 = arith.constant dense<0.000000e+00> : vector<2x128xf32>
    %6 = tpu.matmul %4, %5, %cst_5 {dimension_numbers = #tpu.dot_dimension_numbers<[1], [0], [0], [1], [0, 0, 1, 1], [], []>} : vector<2x32xbf16>, vector<32x128xbf16>, vector<2x128xf32> -> vector<2x128xf32>
    %c0_6 = arith.constant 0 : index
    %c0_7 = arith.constant 0 : index
    %7 = vector.load %arg2[%c0_6, %c0_7] : memref<2x32xbf16, #tpu.memory_space<vmem>>, vector<2x32xbf16>
    %c0_8 = arith.constant 0 : index
    %c0_9 = arith.constant 0 : index
    %8 = vector.load %arg4[%c0_8, %c0_9] : memref<32x32xbf16, #tpu.memory_space<vmem>>, vector<32x32xbf16>
    %cst_10 = arith.constant dense<0.000000e+00> : vector<2x32xf32>
    %9 = tpu.matmul %7, %8, %cst_10 {dimension_numbers = #tpu.dot_dimension_numbers<[1], [0], [0], [1], [0, 0, 1, 1], [], []>} : vector<2x32xbf16>, vector<32x32xbf16>, vector<2x32xf32> -> vector<2x32xf32>
    %10 = math.tanh %9 : vector<2x32xf32>
    %11 = arith.truncf %10 : vector<2x32xf32> to vector<2x32xbf16>
    %c0_11 = arith.constant 0 : index
    %c0_12 = arith.constant 0 : index
    %12 = vector.load %arg6[%c0_11, %c0_12] : memref<32x128xbf16, #tpu.memory_space<vmem>>, vector<32x128xbf16>
    %cst_13 = arith.constant dense<0.000000e+00> : vector<2x128xf32>
    %13 = tpu.matmul %11, %12, %cst_13 {dimension_numbers = #tpu.dot_dimension_numbers<[1], [0], [0], [1], [0, 0, 1, 1], [], []>} : vector<2x32xbf16>, vector<32x128xbf16>, vector<2x128xf32> -> vector<2x128xf32>
    %14 = arith.addf %6, %13 : vector<2x128xf32>
    %c0_14 = arith.constant 0 : index
    %c0_15 = arith.constant 0 : index
    %15 = vector.load %arg7[%c0_14, %c0_15] : memref<1x128xf32, #tpu.memory_space<vmem>>, vector<1x128xf32>
    %16 = vector.broadcast %15 : vector<1x128xf32> to vector<2x128xf32>
    %17 = arith.addf %14, %16 : vector<2x128xf32>
    %c0_16 = arith.constant 0 : index
    %c0_17 = arith.constant 0 : index
    %18 = vector.load %arg8[%c0_16, %c0_17] : memref<2x128xf32, #tpu.memory_space<vmem>>, vector<2x128xf32>
    tpu.vector_store %arg8[%c0_16, %c0_17], %17 {strides = array<i32>} : memref<2x128xf32, #tpu.memory_space<vmem>>, vector<2x128xf32>,
    return
  }
  func.func @transform_0(%arg0: i32) -> (i32, i32) {
    %c0_i32 = arith.constant 0 : i32
    %c0_i32_0 = arith.constant 0 : i32
    return %arg0, %c0_i32 : i32, i32
  }
  func.func @transform_1(%arg0: i32) -> (i32, i32) {
    %c0_i32 = arith.constant 0 : i32
    %c0_i32_0 = arith.constant 0 : i32
    return %arg0, %c0_i32 : i32, i32
  }
  func.func @transform_2(%arg0: i32) -> (i32, i32) {
    %c0_i32 = arith.constant 0 : i32
    %c0_i32_0 = arith.constant 0 : i32
    %c0_i32_1 = arith.constant 0 : i32
    return %c0_i32, %c0_i32_0 : i32, i32
  }
  func.func @transform_3(%arg0: i32) -> (i32, i32) {
    %c0_i32 = arith.constant 0 : i32
    %c0_i32_0 = arith.constant 0 : i32
    %c0_i32_1 = arith.constant 0 : i32
    return %c0_i32, %c0_i32_0 : i32, i32
  }
  func.func @transform_4(%arg0: i32) -> (i32, i32) {
    %c0_i32 = arith.constant 0 : i32
    %c0_i32_0 = arith.constant 0 : i32
    %c0_i32_1 = arith.constant 0 : i32
    return %c0_i32, %c0_i32_0 : i32, i32
  }
  func.func @transform_5(%arg0: i32) -> (i32, i32) {
    %c0_i32 = arith.constant 0 : i32
    %c0_i32_0 = arith.constant 0 : i32
    %c0_i32_1 = arith.constant 0 : i32
    return %c0_i32, %c0_i32_0 : i32, i32
  }
  func.func @transform_6(%arg0: i32) -> (i32, i32) {
    %c0_i32 = arith.constant 0 : i32
    %c0_i32_0 = arith.constant 0 : i32
    %c0_i32_1 = arith.constant 0 : i32
    return %c0_i32, %c0_i32_0 : i32, i32
  }
  func.func @transform_7(%arg0: i32) -> (i32, i32) {
    %c0_i32 = arith.constant 0 : i32
    %c0_i32_0 = arith.constant 0 : i32
    return %arg0, %c0_i32 : i32, i32
  }
}

module attributes {stable_mosaic.version = 11 : i64} {
  func.func @_fusion_kernel(%arg0: i32, %arg1: memref<2x4xbf16, #tpu.memory_space<vmem>>, %arg2: memref<2x32xbf16, #tpu.memory_space<vmem>>, %arg3: memref<4x32xbf16, #tpu.memory_space<vmem>>, %arg4: memref<32x32xbf16, #tpu.memory_space<vmem>>, %arg5: memref<32x128xbf16, #tpu.memory_space<vmem>>, %arg6: memref<32x128xbf16, #tpu.memory_space<vmem>>, %arg7: memref<1x128xf32, #tpu.memory_space<vmem>>, %arg8: memref<2x128xf32, #tpu.memory_space<vmem>>) attributes {dimension_semantics = [#tpu.dimension_semantics<parallel>], iteration_bounds = array<i64: 1>, scalar_prefetch = 0 : i64, scratch_operands = 0 : i64, tpu.core_type = #tpu.core_type<tc>, window_params = [{transform_indices = @transform_0, window_bounds = array<i64: 2, 4>}, {transform_indices = @transform_1, window_bounds = array<i64: 2, 32>}, {pipeline_mode = #tpu.pipeline_mode<synchronous>, transform_indices = @transform_2, window_bounds = array<i64: 4, 32>}, {pipeline_mode = #tpu.pipeline_mode<synchronous>, transform_indices = @transform_3, window_bounds = array<i64: 32, 32>}, {pipeline_mode = #tpu.pipeline_mode<synchronous>, transform_indices = @transform_4, window_bounds = array<i64: 32, 128>}, {pipeline_mode = #tpu.pipeline_mode<synchronous>, transform_indices = @transform_5, window_bounds = array<i64: 32, 128>}, {pipeline_mode = #tpu.pipeline_mode<synchronous>, transform_indices = @transform_6, window_bounds = array<i64: 1, 128>}, {transform_indices = @transform_7, window_bounds = array<i64: 2, 128>}]} {
    %c0 = arith.constant 0 : index
    %c0_0 = arith.constant 0 : index
    %0 = vector.load %arg1[%c0, %c0_0] : memref<2x4xbf16, #tpu.memory_space<vmem>>, vector<2x4xbf16>
    %c0_1 = arith.constant 0 : index
    %c0_2 = arith.constant 0 : index
    %1 = vector.load %arg3[%c0_1, %c0_2] : memref<4x32xbf16, #tpu.memory_space<vmem>>, vector<4x32xbf16>
    %cst = arith.constant dense<0.000000e+00> : vector<2x32xf32>
    %2 = tpu.matmul %0, %1, %cst {dimension_numbers = #tpu.dot_dimension_numbers<[1], [0], [0], [1], [0, 0, 1, 1], [], []>} : vector<2x4xbf16>, vector<4x32xbf16>, vector<2x32xf32> -> vector<2x32xf32>
    %3 = math.tanh %2 : vector<2x32xf32>
    %4 = arith.truncf %3 : vector<2x32xf32> to vector<2x32xbf16>
    %c0_3 = arith.constant 0 : index
    %c0_4 = arith.constant 0 : index
    %5 = vector.load %arg5[%c0_3, %c0_4] : memref<32x128xbf16, #tpu.memory_space<vmem>>, vector<32x128xbf16>
    %cst_5 = arith.constant dense<0.000000e+00> : vector<2x128xf32>
    %6 = tpu.matmul %4, %5, %cst_5 {dimension_numbers = #tpu.dot_dimension_numbers<[1], [0], [0], [1], [0, 0, 1, 1], [], []>} : vector<2x32xbf16>, vector<32x128xbf16>, vector<2x128xf32> -> vector<2x128xf32>
    %c0_6 = arith.constant 0 : index
    %c0_7 = arith.constant 0 : index
    %7 = vector.load %arg2[%c0_6, %c0_7] : memref<2x32xbf16, #tpu.memory_space<vmem>>, vector<2x32xbf16>
    %c0_8 = arith.constant 0 : index
    %c0_9 = arith.constant 0 : index
    %8 = vector.load %arg4[%c0_8, %c0_9] : memref<32x32xbf16, #tpu.memory_space<vmem>>, vector<32x32xbf16>
    %cst_10 = arith.constant dense<0.000000e+00> : vector<2x32xf32>
    %9 = tpu.matmul %7, %8, %cst_10 {dimension_numbers = #tpu.dot_dimension_numbers<[1], [0], [0], [1], [0, 0, 1, 1], [], []>} : vector<2x32xbf16>, vector<32x32xbf16>, vector<2x32xf32> -> vector<2x32xf32>
    %10 = math.tanh %9 : vector<2x32xf32>
    %11 = arith.truncf %10 : vector<2x32xf32> to vector<2x32xbf16>
    %c0_11 = arith.constant 0 : index
    %c0_12 = arith.constant 0 : index
    %12 = vector.load %arg6[%c0_11, %c0_12] : memref<32x128xbf16, #tpu.memory_space<vmem>>, vector<32x128xbf16>
    %cst_13 = arith.constant dense<0.000000e+00> : vector<2x128xf32>
    %13 = tpu.matmul %11, %12, %cst_13 {dimension_numbers = #tpu.dot_dimension_numbers<[1], [0], [0], [1], [0, 0, 1, 1], [], []>} : vector<2x32xbf16>, vector<32x128xbf16>, vector<2x128xf32> -> vector<2x128xf32>
    %14 = arith.addf %6, %13 : vector<2x128xf32>
    %c0_14 = arith.constant 0 : index
    %c0_15 = arith.constant 0 : index
    %15 = vector.load %arg7[%c0_14, %c0_15] : memref<1x128xf32, #tpu.memory_space<vmem>>, vector<1x128xf32>
    %16 = vector.broadcast %15 : vector<1x128xf32> to vector<2x128xf32>
    %17 = arith.addf %14, %16 : vector<2x128xf32>
    %c0_16 = arith.constant 0 : index
    %c0_17 = arith.constant 0 : index
    %18 = vector.load %arg8[%c0_16, %c0_17] : memref<2x128xf32, #tpu.memory_space<vmem>>, vector<2x128xf32>
    tpu.vector_store %arg8[%c0_16, %c0_17], %17 {strides = array<i32>} : memref<2x128xf32, #tpu.memory_space<vmem>>, vector<2x128xf32>,
    return
  }
  func.func @transform_0(%arg0: i32) -> (i32, i32) {
    %c0_i32 = arith.constant 0 : i32
    %c0_i32_0 = arith.constant 0 : i32
    return %arg0, %c0_i32 : i32, i32
  }
  func.func @transform_1(%arg0: i32) -> (i32, i32) {
    %c0_i32 = arith.constant 0 : i32
    %c0_i32_0 = arith.constant 0 : i32
    return %arg0, %c0_i32 : i32, i32
  }
  func.func @transform_2(%arg0: i32) -> (i32, i32) {
    %c0_i32 = arith.constant 0 : i32
    %c0_i32_0 = arith.constant 0 : i32
    %c0_i32_1 = arith.constant 0 : i32
    return %c0_i32, %c0_i32_0 : i32, i32
  }
  func.func @transform_3(%arg0: i32) -> (i32, i32) {
    %c0_i32 = arith.constant 0 : i32
    %c0_i32_0 = arith.constant 0 : i32
    %c0_i32_1 = arith.constant 0 : i32
    return %c0_i32, %c0_i32_0 : i32, i32
  }
  func.func @transform_4(%arg0: i32) -> (i32, i32) {
    %c0_i32 = arith.constant 0 : i32
    %c0_i32_0 = arith.constant 0 : i32
    %c0_i32_1 = arith.constant 0 : i32
    return %c0_i32, %c0_i32_0 : i32, i32
  }
  func.func @transform_5(%arg0: i32) -> (i32, i32) {
    %c0_i32 = arith.constant 0 : i32
    %c0_i32_0 = arith.constant 0 : i32
    %c0_i32_1 = arith.constant 0 : i32
    return %c0_i32, %c0_i32_0 : i32, i32
  }
  func.func @transform_6(%arg0: i32) -> (i32, i32) {
    %c0_i32 = arith.constant 0 : i32
    %c0_i32_0 = arith.constant 0 : i32
    %c0_i32_1 = arith.constant 0 : i32
    return %c0_i32, %c0_i32_0 : i32, i32
  }
  func.func @transform_7(%arg0: i32) -> (i32, i32) {
    %c0_i32 = arith.constant 0 : i32
    %c0_i32_0 = arith.constant 0 : i32
    return %arg0, %c0_i32 : i32, i32
  }
}

</mosaic_0001>

<bundles_post_ra>
// kernel: tpu_custom_call.1
= control target key start
LH: loop header
LB: loop body
LE: loop exit
PB: predicated region body
PF: predicated region fallthrough
CT: control target
= control target key end

     0   :  { %12 = vsyncpa [#allocation3], 0  ;;  %s569_s0 = inlined_call_operand.hbm [shape: bf16[2,4], index: 0, kind: input, shape index: {}]   ;;  %s570_s1 = inlined_call_operand.hbm [shape: bf16[2,32], index: 1, kind: input, shape index: {}]   ;;  %s571_s2 = inlined_call_operand.hbm [shape: bf16[4,32], index: 2, kind: input, shape index: {}]   ;;  %s572_s3 = inlined_call_operand.hbm [shape: bf16[32,32], index: 3, kind: input, shape index: {}]   ;;  %s573_s4 = inlined_call_operand.hbm [shape: bf16[32,128], index: 4, kind: input, shape index: {}]   ;;  %s574_s5 = inlined_call_operand.hbm [shape: bf16[32,128], index: 5, kind: input, shape index: {}]   ;;  %s575_s6 = inlined_call_operand.vmem [shape: f32[1,128], index: 6, kind: input, shape index: {}]   ;;  %s576_s7 = inlined_call_operand.hbm [shape: f32[2,128], index: 7, kind: output, shape index: {}]  }
   0x1   :  { %13 = vsyncpa [#allocation6], 0 }
   0x2   :  { %14 = vsyncpa [#allocation9], 0 }
   0x3   :  { %15 = vsyncpa [#allocation12], 0  ;;  %s33_s26 = sshll.u32 %s570_s1, 4  ;;  %s34_s26 = int_to_ptr.hbm [resolvable:$true] %s33_s26 }
   0x4   :  { %16 = vsyncpa [#allocation4], 0  ;;  %s493_s27 = smov [#allocation5]   ;;  %s54_s8 = sshll.u32 %s572_s3, 4  ;;  %s55_s8 = int_to_ptr.hbm [resolvable:$true] %s54_s8 }
   0x5   :  { %s35_s28 = sshll.u32 %s493_s27, 4  ;;  %s494_s9 = smov [#allocation8]   ;;  %s36_s28 = int_to_ptr.vmem [resolvable:$true] %s35_s28 }
   0x6   :  { %38 = dma.hbm_to_vmem [thread:$0]  %s34_s26, 16, %s36_s28, [#allocation6]  }
   0x7   :  { %s56_s10 = sshll.u32 %s494_s9, 4  ;;  %s495_s11 = smov 64   ;;  %s57_s10 = int_to_ptr.vmem [resolvable:$true] %s56_s10 }
   0x8   :  { %s496_s12 = smov 4   ;;  %s22_s1 = sshll.u32 %s569_s0, 4  ;;  %s23_s1 = int_to_ptr.hbm [resolvable:$true] %s22_s1 }
   0x9   :  { %62 = dma.hbm_to_vmem [thread:$0]  %s55_s8, 256, %s57_s10, [#allocation9], %s495_s11, %s495_s11, %s496_s12  }
   0xa   :  { %s497_s15 = smov [#allocation2]   ;;  %s44_s3 = sshll.u32 %s571_s2, 4  ;;  %s45_s3 = int_to_ptr.hbm [resolvable:$true] %s44_s3 }
   0xb   :  { %s24_s16 = sshll.u32 %s497_s15, 4  ;;  %s498_s19 = smov [#allocation7]   ;;  %s25_s16 = int_to_ptr.vmem [resolvable:$true] %s24_s16 }
   0xc   :  { %27 = dma.hbm_to_vmem [thread:$0]  %s23_s1, 16, %s25_s16, [#allocation3]  }
   0xd   :  { %s46_s20 = sshll.u32 %s498_s19, 4  ;;  %s67_s23 = sshll.u32 %s573_s4, 4  ;;  %s47_s20 = int_to_ptr.vmem [resolvable:$true] %s46_s20  ;;  %s68_s23 = int_to_ptr.hbm [resolvable:$true] %s67_s23 }
   0xe   :  { %49 = dma.hbm_to_vmem [thread:$0]  %s45_s3, 32, %s47_s20, [#allocation6]  }
   0xf   :  { %s80_s25 = sshll.u32 %s574_s5, 4  ;;  %s499_s26 = smov [#allocation10]   ;;  %s81_s25 = int_to_ptr.hbm [resolvable:$true] %s80_s25 }
  0x10   :  { %s69_s27 = sshll.u32 %s499_s26, 4  ;;  %s500_s2 = smov [#allocation11]   ;;  %s70_s27 = int_to_ptr.vmem [resolvable:$true] %s69_s27 }
  0x11   :  { %75 = dma.hbm_to_vmem [thread:$0]  %s68_s23, 256, %s70_s27, [#allocation9], %s495_s11, %s495_s11, %s496_s12  }
  0x12   :  { %s82_s28 = sshll.u32 %s500_s2, 4  ;;  %s83_s28 = int_to_ptr.vmem [resolvable:$true] %s82_s28 }
  0x13   :  { %88 = dma.hbm_to_vmem [thread:$0]  %s81_s25, 256, %s83_s28, [#allocation12], %s495_s11, %s495_s11, %s496_s12  }
  0x14   :  { %483 = dma.done.wait [#allocation3], 16  }
  0x15   :  { %484 = vsyncadd [#allocation3], 4294967280 }
  0x16   :  { %485 = dma.done.wait [#allocation6], 48  }
  0x17   :  { %486 = vsyncadd [#allocation6], 4294967248 }
  0x18   :  { %487 = dma.done.wait [#allocation9], 512  }
  0x19   :  { %488 = vsyncadd [#allocation9], 4294966784 }
  0x1a   :  { %489 = dma.done.wait [#allocation12], 256  }
  0x1b   :  { %490 = vsyncadd [#allocation12], 4294967040  ;;  %vm122_vm0 = vcmask 1041408   ;;  %v117_v0 = vld [vmem:[#allocation7] sm:$0x3]  ;;  %v298_v1 = vld [vmem:[#allocation8 + $0x8] sm:$0xff] }
  0x1c   :  { %v124_v2 = vsel %vm122_vm0, %v117_v0, 0  ;;  %172 = vmatpush.bf16.msra.mxu1 %v298_v1  ;;  %v116_v3 = vld [vmem:[#allocation2] sm:$0x1]  ;;  %vm118_vm1 = vcmask 31744   ;;  %v297_v4 = vld [vmem:[#allocation8] sm:$0xff]  ;;  %vm162_vm2 = vcmask 261120  }
  0x1d   :  { %133 = vmatpush.bf16.msra.mxu0 %v124_v2  ;;  %v145_v5 = vld [vmem:[#allocation5] sm:$0x1]  ;;  %v295_v7 = vld [vmem:[#allocation10] sm:$0xff]  ;;  %v300_v8 = vld [vmem:[#allocation11 + $0x8] sm:$0xff]  ;;  %s501_s29 = smov [#allocation13]   ;;  %s254_s10 = sshll.u32 %s576_s7, 4  ;;  %s255_s10 = int_to_ptr.hbm [resolvable:$true] %s254_s10 }
  0x1e   :  { %v296_v6 = vld [vmem:[#allocation10 + $0x8] sm:$0xff]  ;;  %206 = vmatpush.bf16.msra.mxu2 %v300_v8  ;;  %v299_v9 = vld [vmem:[#allocation11] sm:$0xff]  ;;  %s252_s30 = sshll.u32 %s501_s29, 4  ;;  %s253_s30 = int_to_ptr.vmem [resolvable:$true] %s252_s30 }
  0x1f   :  { %234 = vmatpush.bf16.msra.mxu3 %v296_v6  ;;  %v310_v19 = vld [vmem:[%s575_s6] ss:$0 sm:$0xff] }
  0x20   :  { %267 = vmatmul.msk.bf16.vlgmr.msra.gmra.mxu0 %vm118_vm1, %v116_v3  ;;  %173 = vmatpush.bf16.msra.mxu1 %v297_v4 }
  0x22   :  { %207 = vmatpush.bf16.msra.mxu2 %v299_v9 }
  0x23   :  { %276 = vmatmul.msk.bf16.vlgmr.msra.gmra.mxu1 %vm162_vm2, %v145_v5  ;;  %235 = vmatpush.bf16.msra.mxu3 %v295_v7 }
  0x9d   :  { %v135_v10 = vpop.f32.mrf.mxu0 }
  0x9e   :  { %311 = vtanh.f32 %v135_v10 }
  0xa0   :  { %v175_v11 = vpop.f32.mrf.mxu1 }
  0xa1   :  { %313 = vtanh.f32 %v175_v11 }
  0xa4   :  { %v312_v12 = vpop.eup %311 }
  0xa5   :  { %v140_v13 = vpack.c.bf16 %v312_v12, %v312_v12  ;;  %v137_v14 = vpop.f32.mrf.mxu0 }
  0xa7   :  { %294 = vmatmul.msk.bf16.vlgmr.msra.gmra.mxu3 %vm162_vm2, %v140_v13  ;;  %v314_v15 = vpop.eup %313 }
  0xa8   :  { %v180_v16 = vpack.c.bf16 %v314_v15, %v314_v15  ;;  %v177_v17 = vpop.f32.mrf.mxu1 }
  0xaa   :  { %285 = vmatmul.msk.bf16.vlgmr.msra.gmra.mxu2 %vm162_vm2, %v180_v16 }
 0x12a   :  { %v237_v18 = vpop.f32.mrf.mxu3 }
 0x12d   :  { %v209_v20 = vpop.f32.mrf.mxu2 }
 0x12e   :  { %v238_v21 = vadd.f32 %v237_v18, %v209_v20 }
 0x130   :  { %v245_v22 = vadd.f32 %v310_v19, %v238_v21 }
 0x132   :  { %v239_v23 = vpop.f32.mrf.mxu3  ;;  %246 = vst [vmem:[#allocation13] sm:$0x3] %v245_v22 }
 0x133   :  { %257 = dma.vmem_to_hbm [thread:$0]  %s253_s30, 32, %s255_s10, [#allocation4]  }
 0x135   :  { %v211_v24 = vpop.f32.mrf.mxu2 }
 0x136   :  { %491 = dma.done.wait [#allocation4], 32  }
 0x137   :  { %492 = vsyncadd [#allocation4], 4294967264 }
 0x138   :  { %262 = vsyncpa [#allocation3], 1 }
 0x139   :  { %263 = vsyncpa [#allocation6], 1 }
 0x13a   :  { %264 = vsyncpa [#allocation9], 1 }
 0x13b   :  { %265 = vsyncpa [#allocation12], 1 }
 0x13c   :  { %266 = vsyncpa [#allocation4], 1 }

// kernel: tpu_custom_call.1
= control target key start
LH: loop header
LB: loop body
LE: loop exit
PB: predicated region body
PF: predicated region fallthrough
CT: control target
= control target key end

     0   :  { %12 = vsyncpa [#allocation3], 0  ;;  %s569_s0 = inlined_call_operand.hbm [shape: bf16[2,4], index: 0, kind: input, shape index: {}]   ;;  %s570_s1 = inlined_call_operand.hbm [shape: bf16[2,32], index: 1, kind: input, shape index: {}]   ;;  %s571_s2 = inlined_call_operand.hbm [shape: bf16[4,32], index: 2, kind: input, shape index: {}]   ;;  %s572_s3 = inlined_call_operand.hbm [shape: bf16[32,32], index: 3, kind: input, shape index: {}]   ;;  %s573_s4 = inlined_call_operand.hbm [shape: bf16[32,128], index: 4, kind: input, shape index: {}]   ;;  %s574_s5 = inlined_call_operand.hbm [shape: bf16[32,128], index: 5, kind: input, shape index: {}]   ;;  %s575_s6 = inlined_call_operand.vmem [shape: f32[1,128], index: 6, kind: input, shape index: {}]   ;;  %s576_s7 = inlined_call_operand.hbm [shape: f32[2,128], index: 7, kind: output, shape index: {}]  }
   0x1   :  { %13 = vsyncpa [#allocation6], 0 }
   0x2   :  { %14 = vsyncpa [#allocation9], 0 }
   0x3   :  { %15 = vsyncpa [#allocation12], 0  ;;  %s33_s26 = sshll.u32 %s570_s1, 4  ;;  %s34_s26 = int_to_ptr.hbm [resolvable:$true] %s33_s26 }
   0x4   :  { %16 = vsyncpa [#allocation4], 0  ;;  %s493_s27 = smov [#allocation5]   ;;  %s54_s8 = sshll.u32 %s572_s3, 4  ;;  %s55_s8 = int_to_ptr.hbm [resolvable:$true] %s54_s8 }
   0x5   :  { %s35_s28 = sshll.u32 %s493_s27, 4  ;;  %s494_s9 = smov [#allocation8]   ;;  %s36_s28 = int_to_ptr.vmem [resolvable:$true] %s35_s28 }
   0x6   :  { %38 = dma.hbm_to_vmem [thread:$0]  %s34_s26, 16, %s36_s28, [#allocation6]  }
   0x7   :  { %s56_s10 = sshll.u32 %s494_s9, 4  ;;  %s495_s11 = smov 64   ;;  %s57_s10 = int_to_ptr.vmem [resolvable:$true] %s56_s10 }
   0x8   :  { %s496_s12 = smov 4   ;;  %s22_s1 = sshll.u32 %s569_s0, 4  ;;  %s23_s1 = int_to_ptr.hbm [resolvable:$true] %s22_s1 }
   0x9   :  { %62 = dma.hbm_to_vmem [thread:$0]  %s55_s8, 256, %s57_s10, [#allocation9], %s495_s11, %s495_s11, %s496_s12  }
   0xa   :  { %s497_s15 = smov [#allocation2]   ;;  %s44_s3 = sshll.u32 %s571_s2, 4  ;;  %s45_s3 = int_to_ptr.hbm [resolvable:$true] %s44_s3 }
   0xb   :  { %s24_s16 = sshll.u32 %s497_s15, 4  ;;  %s498_s19 = smov [#allocation7]   ;;  %s25_s16 = int_to_ptr.vmem [resolvable:$true] %s24_s16 }
   0xc   :  { %27 = dma.hbm_to_vmem [thread:$0]  %s23_s1, 16, %s25_s16, [#allocation3]  }
   0xd   :  { %s46_s20 = sshll.u32 %s498_s19, 4  ;;  %s67_s23 = sshll.u32 %s573_s4, 4  ;;  %s47_s20 = int_to_ptr.vmem [resolvable:$true] %s46_s20  ;;  %s68_s23 = int_to_ptr.hbm [resolvable:$true] %s67_s23 }
   0xe   :  { %49 = dma.hbm_to_vmem [thread:$0]  %s45_s3, 32, %s47_s20, [#allocation6]  }
   0xf   :  { %s80_s25 = sshll.u32 %s574_s5, 4  ;;  %s499_s26 = smov [#allocation10]   ;;  %s81_s25 = int_to_ptr.hbm [resolvable:$true] %s80_s25 }
  0x10   :  { %s69_s27 = sshll.u32 %s499_s26, 4  ;;  %s500_s2 = smov [#allocation11]   ;;  %s70_s27 = int_to_ptr.vmem [resolvable:$true] %s69_s27 }
  0x11   :  { %75 = dma.hbm_to_vmem [thread:$0]  %s68_s23, 256, %s70_s27, [#allocation9], %s495_s11, %s495_s11, %s496_s12  }
  0x12   :  { %s82_s28 = sshll.u32 %s500_s2, 4  ;;  %s83_s28 = int_to_ptr.vmem [resolvable:$true] %s82_s28 }
  0x13   :  { %88 = dma.hbm_to_vmem [thread:$0]  %s81_s25, 256, %s83_s28, [#allocation12], %s495_s11, %s495_s11, %s496_s12  }
  0x14   :  { %483 = dma.done.wait [#allocation3], 16  }
  0x15   :  { %484 = vsyncadd [#allocation3], 4294967280 }
  0x16   :  { %485 = dma.done.wait [#allocation6], 48  }
  0x17   :  { %486 = vsyncadd [#allocation6], 4294967248 }
  0x18   :  { %487 = dma.done.wait [#allocation9], 512  }
  0x19   :  { %488 = vsyncadd [#allocation9], 4294966784 }
  0x1a   :  { %489 = dma.done.wait [#allocation12], 256  }
  0x1b   :  { %490 = vsyncadd [#allocation12], 4294967040  ;;  %vm122_vm0 = vcmask 1041408   ;;  %v117_v0 = vld [vmem:[#allocation7] sm:$0x3]  ;;  %v298_v1 = vld [vmem:[#allocation8 + $0x8] sm:$0xff] }
  0x1c   :  { %v124_v2 = vsel %vm122_vm0, %v117_v0, 0  ;;  %172 = vmatpush.bf16.msra.mxu1 %v298_v1  ;;  %v116_v3 = vld [vmem:[#allocation2] sm:$0x1]  ;;  %vm118_vm1 = vcmask 31744   ;;  %v297_v4 = vld [vmem:[#allocation8] sm:$0xff]  ;;  %vm162_vm2 = vcmask 261120  }
  0x1d   :  { %133 = vmatpush.bf16.msra.mxu0 %v124_v2  ;;  %v145_v5 = vld [vmem:[#allocation5] sm:$0x1]  ;;  %v295_v7 = vld [vmem:[#allocation10] sm:$0xff]  ;;  %v300_v8 = vld [vmem:[#allocation11 + $0x8] sm:$0xff]  ;;  %s501_s29 = smov [#allocation13]   ;;  %s254_s10 = sshll.u32 %s576_s7, 4  ;;  %s255_s10 = int_to_ptr.hbm [resolvable:$true] %s254_s10 }
  0x1e   :  { %v296_v6 = vld [vmem:[#allocation10 + $0x8] sm:$0xff]  ;;  %206 = vmatpush.bf16.msra.mxu2 %v300_v8  ;;  %v299_v9 = vld [vmem:[#allocation11] sm:$0xff]  ;;  %s252_s30 = sshll.u32 %s501_s29, 4  ;;  %s253_s30 = int_to_ptr.vmem [resolvable:$true] %s252_s30 }
  0x1f   :  { %234 = vmatpush.bf16.msra.mxu3 %v296_v6  ;;  %v310_v19 = vld [vmem:[%s575_s6] ss:$0 sm:$0xff] }
  0x20   :  { %267 = vmatmul.msk.bf16.vlgmr.msra.gmra.mxu0 %vm118_vm1, %v116_v3  ;;  %173 = vmatpush.bf16.msra.mxu1 %v297_v4 }
  0x22   :  { %207 = vmatpush.bf16.msra.mxu2 %v299_v9 }
  0x23   :  { %276 = vmatmul.msk.bf16.vlgmr.msra.gmra.mxu1 %vm162_vm2, %v145_v5  ;;  %235 = vmatpush.bf16.msra.mxu3 %v295_v7 }
  0x9d   :  { %v135_v10 = vpop.f32.mrf.mxu0 }
  0x9e   :  { %311 = vtanh.f32 %v135_v10 }
  0xa0   :  { %v175_v11 = vpop.f32.mrf.mxu1 }
  0xa1   :  { %313 = vtanh.f32 %v175_v11 }
  0xa4   :  { %v312_v12 = vpop.eup %311 }
  0xa5   :  { %v140_v13 = vpack.c.bf16 %v312_v12, %v312_v12  ;;  %v137_v14 = vpop.f32.mrf.mxu0 }
  0xa7   :  { %294 = vmatmul.msk.bf16.vlgmr.msra.gmra.mxu3 %vm162_vm2, %v140_v13  ;;  %v314_v15 = vpop.eup %313 }
  0xa8   :  { %v180_v16 = vpack.c.bf16 %v314_v15, %v314_v15  ;;  %v177_v17 = vpop.f32.mrf.mxu1 }
  0xaa   :  { %285 = vmatmul.msk.bf16.vlgmr.msra.gmra.mxu2 %vm162_vm2, %v180_v16 }
 0x12a   :  { %v237_v18 = vpop.f32.mrf.mxu3 }
 0x12d   :  { %v209_v20 = vpop.f32.mrf.mxu2 }
 0x12e   :  { %v238_v21 = vadd.f32 %v237_v18, %v209_v20 }
 0x130   :  { %v245_v22 = vadd.f32 %v310_v19, %v238_v21 }
 0x132   :  { %v239_v23 = vpop.f32.mrf.mxu3  ;;  %246 = vst [vmem:[#allocation13] sm:$0x3] %v245_v22 }
 0x133   :  { %257 = dma.vmem_to_hbm [thread:$0]  %s253_s30, 32, %s255_s10, [#allocation4]  }
 0x135   :  { %v211_v24 = vpop.f32.mrf.mxu2 }
 0x136   :  { %491 = dma.done.wait [#allocation4], 32  }
 0x137   :  { %492 = vsyncadd [#allocation4], 4294967264 }
 0x138   :  { %262 = vsyncpa [#allocation3], 1 }
 0x139   :  { %263 = vsyncpa [#allocation6], 1 }
 0x13a   :  { %264 = vsyncpa [#allocation9], 1 }
 0x13b   :  { %265 = vsyncpa [#allocation12], 1 }
 0x13c   :  { %266 = vsyncpa [#allocation4], 1 }

</bundles_post_ra>
